<compile_context>
chip_gen: v7x
topology: tpu7x:2x2x1
jax: 0.10.0
libtpu: 0.0.40
codegen_flags: <defaults>
</compile_context>

<pallas_src>
import functools

import jax
import jax.numpy as jnp
from jax import lax
from jax.experimental import pallas as pl
from jax.experimental.pallas import tpu as pltpu


# -----------------------------------------------------------------------------
# Fused MHA kernel: one grid step = one batch element, all heads + all matmuls
# -----------------------------------------------------------------------------
def _fused_mha_kernel(x_ref, wa_ref, ba_ref, wo_ref, bo_ref, o_ref, *,
                      n_head, scale, compute_dtype):
    # x_ref : (1, T, C)      wa_ref: (C, 3C)   ba_ref: (1, 3C)  [f32]
    # wo_ref: (C, C) fused   bo_ref: (1, C)    [f32]            o_ref: (1, T, C)
    _, T, C = x_ref.shape
    H = n_head
    hd = C // H
    approx = jnp.dtype(compute_dtype) != jnp.dtype(jnp.float32)

    x = x_ref[0].astype(compute_dtype)                                 # (T, C)

    # ---- QKV projection: one MXU matmul for all heads, f32 accumulate ----
    qkv = jnp.dot(x, wa_ref[...], preferred_element_type=jnp.float32)  # (T, 3C)
    qkv = qkv + ba_ref[...]                                            # bias in f32

    # Causal mask, shared across heads.
    row = lax.broadcasted_iota(jnp.int32, (T, T), 0)
    col = lax.broadcasted_iota(jnp.int32, (T, T), 1)
    causal = row >= col

    # ---- per-head causal attention + fused output projection ----
    # The (c_proj @ proj) projection is applied per head as
    #   out += o_h @ W_out[h*hd:(h+1)*hd, :]
    # so the head outputs never need to be concatenated/stored; the only store
    # is the final lane-dense (T, C) block.
    out = jnp.zeros((T, C), jnp.float32)
    for h in range(H):                       # static unroll: all heads this step
        off = h * hd
        # Fold the 1/sqrt(hd) scale into q (O(T*hd) VALU work, not O(T^2)).
        q = (qkv[:, off:off + hd] * scale).astype(compute_dtype)          # (T, hd)
        k = qkv[:, C + off:C + off + hd].astype(compute_dtype)            # (T, hd)
        v = qkv[:, 2 * C + off:2 * C + off + hd].astype(compute_dtype)    # (T, hd)

        # Contract the last dims directly -- no explicit k transpose.
        s = lax.dot_general(q, k, (((1,), (1,)), ((), ())),
                            preferred_element_type=jnp.float32)           # (T, T)
        s = jnp.where(causal, s, -jnp.inf)

        m = jnp.max(s, axis=-1, keepdims=True)
        p = jnp.exp(s - m)
        denom = jnp.sum(p, axis=-1, keepdims=True)
        p = p * pl.reciprocal(denom, approx=approx)                       # EUP in bf16 path

        o_h = jnp.dot(p.astype(compute_dtype), v,
                      preferred_element_type=jnp.float32)                 # (T, hd)

        out = out + jnp.dot(o_h.astype(compute_dtype),
                            wo_ref[off:off + hd, :],
                            preferred_element_type=jnp.float32)           # (T, C)

    out = out + bo_ref[...]                                               # fused bias, f32
    o_ref[0] = out.astype(o_ref.dtype)


# -----------------------------------------------------------------------------
# Wrapper
# -----------------------------------------------------------------------------
def multi_head_attention(x, params, *, compute_dtype=jnp.bfloat16):
    """Forward pass of MultiHeadAttention: CausalSelfAttention -> proj -> drop(eval)."""
    B, T, C = x.shape
    H = params["n_head"]
    assert C % H == 0
    hd = C // H
    scale = 1.0 / float(hd) ** 0.5
    f32 = jnp.float32
    wdt = jnp.dtype(compute_dtype)

    # Algebraically fuse the two back-to-back C->C projections at trace time.
    w_out = params["w_cproj"].astype(f32) @ params["w_proj"].astype(f32)          # (C, C)
    b_out = params["b_cproj"].astype(f32) @ params["w_proj"].astype(f32) \
        + params["b_proj"].astype(f32)                                            # (C,)

    # Weights in the MXU compute dtype (halves weight DMA bytes in bf16 mode);
    # biases stay f32 (added to the f32 accumulators).
    w_attn = params["w_attn"].astype(wdt)
    w_out = w_out.astype(wdt)
    b_attn = params["b_attn"].reshape(1, 3 * C).astype(f32)
    b_out = b_out.reshape(1, C).astype(f32)

    kern = functools.partial(_fused_mha_kernel, n_head=H, scale=scale,
                             compute_dtype=wdt)

    # Advisory cost estimate so XLA schedules around the fused custom call.
    flops = B * (2 * T * C * 3 * C      # qkv projection
                 + 4 * T * T * C        # q.k^T and p.v across all heads
                 + 2 * T * C * C)       # fused output projection
    cost = pl.CostEstimate(
        flops=flops,
        transcendentals=B * H * T * T,  # exp in softmax
        bytes_accessed=(2 * B * T * C * x.dtype.itemsize
                        + (C * 3 * C + C * C) * wdt.itemsize
                        + (3 * C + C) * 4),
    )

    return pl.pallas_call(
        kern,
        out_shape=jax.ShapeDtypeStruct((B, T, C), x.dtype),
        grid=(B,),
        in_specs=[
            pl.BlockSpec((1, T, C), lambda b: (b, 0, 0)),       # x
            pl.BlockSpec((C, 3 * C), lambda b: (0, 0)),         # w_attn (resident)
            pl.BlockSpec((1, 3 * C), lambda b: (0, 0)),         # b_attn
            pl.BlockSpec((C, C), lambda b: (0, 0)),             # fused w_out
            pl.BlockSpec((1, C), lambda b: (0, 0)),             # fused b_out
        ],
        out_specs=pl.BlockSpec((1, T, C), lambda b: (b, 0, 0)),  # lane-dense output
        compiler_params=pltpu.CompilerParams(
            dimension_semantics=("parallel",),
            vmem_limit_bytes=32 * 1024 * 1024,
        ),
        cost_estimate=cost,
    )(x, w_attn, b_attn, w_out, b_out)


# -----------------------------------------------------------------------------
# Pure-JAX reference (mirrors the PyTorch module exactly: separate projections)
# -----------------------------------------------------------------------------
def reference(x, params):
    B, T, C = x.shape
    H = params["n_head"]
    hd = C // H
    qkv = x @ params["w_attn"] + params["b_attn"]
    q, k, v = jnp.split(qkv, 3, axis=-1)
    to_heads = lambda t: t.reshape(B, T, H, hd).transpose(0, 2, 1, 3)
    q, k, v = to_heads(q), to_heads(k), to_heads(v)
    s = jnp.einsum("bhqd,bhkd->bhqk", q, k) / jnp.sqrt(jnp.float32(hd))
    mask = jnp.tril(jnp.ones((T, T), dtype=bool))
    s = jnp.where(mask, s, -jnp.inf)
    p = jax.nn.softmax(s, axis=-1)
    y = jnp.einsum("bhqk,bhkd->bhqd", p, v)
    y = y.transpose(0, 2, 1, 3).reshape(B, T, C)
    y = y @ params["w_cproj"] + params["b_cproj"]
    y = y @ params["w_proj"] + params["b_proj"]
    return y


# -----------------------------------------------------------------------------
# Main
# -----------------------------------------------------------------------------
if __name__ == "__main__":
    # Config: n_embd=32, n_head=4 -> head_dim=8; batch=2, seq=8
    B, T, C, H = 2, 8, 32, 4
    key = jax.random.PRNGKey(0)
    k_x, k1, k2, k3, k4, k5, k6 = jax.random.split(key, 7)

    x = jax.random.normal(k_x, (B, T, C), dtype=jnp.float32)

    params = {
        "n_head": H,
        # c_attn: Linear(C, 3C) -- stored pre-transposed as (in, out)
        "w_attn": jax.random.normal(k1, (C, 3 * C), jnp.float32) * 0.02,
        "b_attn": jax.random.normal(k2, (3 * C,), jnp.float32) * 0.02,
        # c_proj inside attention: Linear(C, C)
        "w_cproj": jax.random.normal(k3, (C, C), jnp.float32) * 0.02,
        "b_cproj": jax.random.normal(k4, (C,), jnp.float32) * 0.02,
        # outer self.proj: Linear(C, C)
        "w_proj": jax.random.normal(k5, (C, C), jnp.float32) * 0.02,
        "b_proj": jax.random.normal(k6, (C,), jnp.float32) * 0.02,
    }

    ref = reference(x, params)

    # Full-precision path: tight semantic check against the reference.
    out_f32 = jax.block_until_ready(
        multi_head_attention(x, params, compute_dtype=jnp.float32))
    assert out_f32.shape == (B, T, C)
    assert jnp.allclose(out_f32, ref, atol=1e-4, rtol=1e-4), "f32 mismatch vs reference"

    # bf16-MXU path (production/perf configuration): looser tolerance.
    out_bf16 = jax.block_until_ready(
        multi_head_attention(x, params, compute_dtype=jnp.bfloat16))
    assert out_bf16.shape == (B, T, C)
    assert jnp.allclose(out_bf16, ref, atol=1e-2, rtol=5e-2), "bf16 mismatch vs reference"

    print("KERNEL_OK")
</pallas_src>

<mosaic_0001>
module attributes {stable_mosaic.version = 11 : i64} {
  func.func @_fused_mha_kernel(%arg0: i32, %arg1: memref<1x8x32xf32, #tpu.memory_space<vmem>>, %arg2: memref<32x96xf32, #tpu.memory_space<vmem>>, %arg3: memref<1x96xf32, #tpu.memory_space<vmem>>, %arg4: memref<32x32xf32, #tpu.memory_space<vmem>>, %arg5: memref<1x32xf32, #tpu.memory_space<vmem>>, %arg6: memref<1x8x32xf32, #tpu.memory_space<vmem>>) attributes {dimension_semantics = [#tpu.dimension_semantics<parallel>], iteration_bounds = array<i64: 2>, scalar_prefetch = 0 : i64, scratch_operands = 0 : i64, tpu.core_type = #tpu.core_type<tc>, window_params = [{transform_indices = @transform_0, window_bounds = array<i64: 1, 8, 32>}, {pipeline_mode = #tpu.pipeline_mode<synchronous>, transform_indices = @transform_1, window_bounds = array<i64: 32, 96>}, {pipeline_mode = #tpu.pipeline_mode<synchronous>, transform_indices = @transform_2, window_bounds = array<i64: 1, 96>}, {pipeline_mode = #tpu.pipeline_mode<synchronous>, transform_indices = @transform_3, window_bounds = array<i64: 32, 32>}, {pipeline_mode = #tpu.pipeline_mode<synchronous>, transform_indices = @transform_4, window_bounds = array<i64: 1, 32>}, {transform_indices = @transform_5, window_bounds = array<i64: 1, 8, 32>}]} {
    %c0 = arith.constant 0 : index
    %c0_0 = arith.constant 0 : index
    %c0_1 = arith.constant 0 : index
    %0 = vector.load %arg1[%c0, %c0_0, %c0_1] : memref<1x8x32xf32, #tpu.memory_space<vmem>>, vector<1x8x32xf32>
    %1 = vector.shape_cast %0 : vector<1x8x32xf32> to vector<8x32xf32>
    %c0_2 = arith.constant 0 : index
    %c0_3 = arith.constant 0 : index
    %2 = vector.load %arg2[%c0_2, %c0_3] : memref<32x96xf32, #tpu.memory_space<vmem>>, vector<32x96xf32>
    %cst = arith.constant dense<0.000000e+00> : vector<8x96xf32>
    %3 = tpu.matmul %1, %2, %cst {dimension_numbers = #tpu.dot_dimension_numbers<[1], [0], [0], [1], [0, 0, 1, 1], [], []>} : vector<8x32xf32>, vector<32x96xf32>, vector<8x96xf32> -> vector<8x96xf32>
    %c0_4 = arith.constant 0 : index
    %c0_5 = arith.constant 0 : index
    %4 = vector.load %arg3[%c0_4, %c0_5] : memref<1x96xf32, #tpu.memory_space<vmem>>, vector<1x96xf32>
    %5 = vector.broadcast %4 : vector<1x96xf32> to vector<8x96xf32>
    %6 = arith.addf %3, %5 : vector<8x96xf32>
    %7 = tpu.iota {dimensions = array<i32: 0>} : vector<8x8xi32>
    %8 = tpu.iota {dimensions = array<i32: 1>} : vector<8x8xi32>
    %9 = arith.cmpi sge, %7, %8 : vector<8x8xi32>
    %cst_6 = arith.constant 0.000000e+00 : f32
    %10 = vector.broadcast %cst_6 : f32 to vector<8x32xf32>
    %11 = vector.extract_strided_slice %6 {offsets = [0, 0], sizes = [8, 8], strides = [1, 1]} : vector<8x96xf32> to vector<8x8xf32>
    %cst_7 = arith.constant 0.353553385 : f32
    %12 = vector.broadcast %cst_7 : f32 to vector<8x8xf32>
    %13 = arith.mulf %11, %12 : vector<8x8xf32>
    %14 = vector.extract_strided_slice %6 {offsets = [0, 32], sizes = [8, 8], strides = [1, 1]} : vector<8x96xf32> to vector<8x8xf32>
    %15 = vector.extract_strided_slice %6 {offsets = [0, 64], sizes = [8, 8], strides = [1, 1]} : vector<8x96xf32> to vector<8x8xf32>
    %cst_8 = arith.constant dense<0.000000e+00> : vector<8x8xf32>
    %16 = tpu.matmul %13, %14, %cst_8 {dimension_numbers = #tpu.dot_dimension_numbers<[1], [1], [0], [0], [0, 0, 1, 0], [], []>} : vector<8x8xf32>, vector<8x8xf32>, vector<8x8xf32> -> vector<8x8xf32>
    %cst_9 = arith.constant 0xFF800000 : f32
    %17 = vector.broadcast %cst_9 : f32 to vector<8x8xf32>
    %18 = arith.select %9, %16, %17 : vector<8x8xi1>, vector<8x8xf32>
    %cst_10 = arith.constant dense<0xFF800000> : vector<8xf32>
    %19 = vector.multi_reduction <maximumf>, %18, %cst_10 [1] : vector<8x8xf32> to vector<8xf32>
    %20 = vector.shape_cast %19 : vector<8xf32> to vector<8x1xf32>
    %21 = vector.broadcast %20 : vector<8x1xf32> to vector<8x8xf32>
    %22 = arith.subf %18, %21 : vector<8x8xf32>
    %23 = math.exp %22 : vector<8x8xf32>
    %cst_11 = arith.constant dense<0.000000e+00> : vector<8xf32>
    %24 = vector.multi_reduction <add>, %23, %cst_11 [1] : vector<8x8xf32> to vector<8xf32>
    %25 = vector.shape_cast %24 : vector<8xf32> to vector<8x1xf32>
    %26 = tpu.reciprocal %25 : vector<8x1xf32> -> vector<8x1xf32>
    %27 = vector.broadcast %26 : vector<8x1xf32> to vector<8x8xf32>
    %28 = arith.mulf %23, %27 : vector<8x8xf32>
    %cst_12 = arith.constant dense<0.000000e+00> : vector<8x8xf32>
    %29 = tpu.matmul %28, %15, %cst_12 {dimension_numbers = #tpu.dot_dimension_numbers<[1], [0], [0], [1], [0, 0, 1, 1], [], []>} : vector<8x8xf32>, vector<8x8xf32>, vector<8x8xf32> -> vector<8x8xf32>
    %c0_13 = arith.constant 0 : index
    %c0_14 = arith.constant 0 : index
    %30 = vector.load %arg4[%c0_13, %c0_14] : memref<32x32xf32, #tpu.memory_space<vmem>>, vector<8x32xf32>
    %cst_15 = arith.constant dense<0.000000e+00> : vector<8x32xf32>
    %31 = tpu.matmul %29, %30, %cst_15 {dimension_numbers = #tpu.dot_dimension_numbers<[1], [0], [0], [1], [0, 0, 1, 1], [], []>} : vector<8x8xf32>, vector<8x32xf32>, vector<8x32xf32> -> vector<8x32xf32>
    %32 = arith.addf %10, %31 : vector<8x32xf32>
    %33 = vector.extract_strided_slice %6 {offsets = [0, 8], sizes = [8, 8], strides = [1, 1]} : vector<8x96xf32> to vector<8x8xf32>
    %cst_16 = arith.constant 0.353553385 : f32
    %34 = vector.broadcast %cst_16 : f32 to vector<8x8xf32>
    %35 = arith.mulf %33, %34 : vector<8x8xf32>
    %36 = vector.extract_strided_slice %6 {offsets = [0, 40], sizes = [8, 8], strides = [1, 1]} : vector<8x96xf32> to vector<8x8xf32>
    %37 = vector.extract_strided_slice %6 {offsets = [0, 72], sizes = [8, 8], strides = [1, 1]} : vector<8x96xf32> to vector<8x8xf32>
    %cst_17 = arith.constant dense<0.000000e+00> : vector<8x8xf32>
    %38 = tpu.matmul %35, %36, %cst_17 {dimension_numbers = #tpu.dot_dimension_numbers<[1], [1], [0], [0], [0, 0, 1, 0], [], []>} : vector<8x8xf32>, vector<8x8xf32>, vector<8x8xf32> -> vector<8x8xf32>
    %cst_18 = arith.constant 0xFF800000 : f32
    %39 = vector.broadcast %cst_18 : f32 to vector<8x8xf32>
    %40 = arith.select %9, %38, %39 : vector<8x8xi1>, vector<8x8xf32>
    %cst_19 = arith.constant dense<0xFF800000> : vector<8xf32>
    %41 = vector.multi_reduction <maximumf>, %40, %cst_19 [1] : vector<8x8xf32> to vector<8xf32>
    %42 = vector.shape_cast %41 : vector<8xf32> to vector<8x1xf32>
    %43 = vector.broadcast %42 : vector<8x1xf32> to vector<8x8xf32>
    %44 = arith.subf %40, %43 : vector<8x8xf32>
    %45 = math.exp %44 : vector<8x8xf32>
    %cst_20 = arith.constant dense<0.000000e+00> : vector<8xf32>
    %46 = vector.multi_reduction <add>, %45, %cst_20 [1] : vector<8x8xf32> to vector<8xf32>
    %47 = vector.shape_cast %46 : vector<8xf32> to vector<8x1xf32>
    %48 = tpu.reciprocal %47 : vector<8x1xf32> -> vector<8x1xf32>
    %49 = vector.broadcast %48 : vector<8x1xf32> to vector<8x8xf32>
    %50 = arith.mulf %45, %49 : vector<8x8xf32>
    %cst_21 = arith.constant dense<0.000000e+00> : vector<8x8xf32>
    %51 = tpu.matmul %50, %37, %cst_21 {dimension_numbers = #tpu.dot_dimension_numbers<[1], [0], [0], [1], [0, 0, 1, 1], [], []>} : vector<8x8xf32>, vector<8x8xf32>, vector<8x8xf32> -> vector<8x8xf32>
    %c8 = arith.constant 8 : index
    %c0_22 = arith.constant 0 : index
    %52 = vector.load %arg4[%c8, %c0_22] : memref<32x32xf32, #tpu.memory_space<vmem>>, vector<8x32xf32>
    %cst_23 = arith.constant dense<0.000000e+00> : vector<8x32xf32>
    %53 = tpu.matmul %51, %52, %cst_23 {dimension_numbers = #tpu.dot_dimension_numbers<[1], [0], [0], [1], [0, 0, 1, 1], [], []>} : vector<8x8xf32>, vector<8x32xf32>, vector<8x32xf32> -> vector<8x32xf32>
    %54 = arith.addf %32, %53 : vector<8x32xf32>
    %55 = vector.extract_strided_slice %6 {offsets = [0, 16], sizes = [8, 8], strides = [1, 1]} : vector<8x96xf32> to vector<8x8xf32>
    %cst_24 = arith.constant 0.353553385 : f32
    %56 = vector.broadcast %cst_24 : f32 to vector<8x8xf32>
    %57 = arith.mulf %55, %56 : vector<8x8xf32>
    %58 = vector.extract_strided_slice %6 {offsets = [0, 48], sizes = [8, 8], strides = [1, 1]} : vector<8x96xf32> to vector<8x8xf32>
    %59 = vector.extract_strided_slice %6 {offsets = [0, 80], sizes = [8, 8], strides = [1, 1]} : vector<8x96xf32> to vector<8x8xf32>
    %cst_25 = arith.constant dense<0.000000e+00> : vector<8x8xf32>
    %60 = tpu.matmul %57, %58, %cst_25 {dimension_numbers = #tpu.dot_dimension_numbers<[1], [1], [0], [0], [0, 0, 1, 0], [], []>} : vector<8x8xf32>, vector<8x8xf32>, vector<8x8xf32> -> vector<8x8xf32>
    %cst_26 = arith.constant 0xFF800000 : f32
    %61 = vector.broadcast %cst_26 : f32 to vector<8x8xf32>
    %62 = arith.select %9, %60, %61 : vector<8x8xi1>, vector<8x8xf32>
    %cst_27 = arith.constant dense<0xFF800000> : vector<8xf32>
    %63 = vector.multi_reduction <maximumf>, %62, %cst_27 [1] : vector<8x8xf32> to vector<8xf32>
    %64 = vector.shape_cast %63 : vector<8xf32> to vector<8x1xf32>
    %65 = vector.broadcast %64 : vector<8x1xf32> to vector<8x8xf32>
    %66 = arith.subf %62, %65 : vector<8x8xf32>
    %67 = math.exp %66 : vector<8x8xf32>
    %cst_28 = arith.constant dense<0.000000e+00> : vector<8xf32>
    %68 = vector.multi_reduction <add>, %67, %cst_28 [1] : vector<8x8xf32> to vector<8xf32>
    %69 = vector.shape_cast %68 : vector<8xf32> to vector<8x1xf32>
    %70 = tpu.reciprocal %69 : vector<8x1xf32> -> vector<8x1xf32>
    %71 = vector.broadcast %70 : vector<8x1xf32> to vector<8x8xf32>
    %72 = arith.mulf %67, %71 : vector<8x8xf32>
    %cst_29 = arith.constant dense<0.000000e+00> : vector<8x8xf32>
    %73 = tpu.matmul %72, %59, %cst_29 {dimension_numbers = #tpu.dot_dimension_numbers<[1], [0], [0], [1], [0, 0, 1, 1], [], []>} : vector<8x8xf32>, vector<8x8xf32>, vector<8x8xf32> -> vector<8x8xf32>
    %c16 = arith.constant 16 : index
    %c0_30 = arith.constant 0 : index
    %74 = vector.load %arg4[%c16, %c0_30] : memref<32x32xf32, #tpu.memory_space<vmem>>, vector<8x32xf32>
    %cst_31 = arith.constant dense<0.000000e+00> : vector<8x32xf32>
    %75 = tpu.matmul %73, %74, %cst_31 {dimension_numbers = #tpu.dot_dimension_numbers<[1], [0], [0], [1], [0, 0, 1, 1], [], []>} : vector<8x8xf32>, vector<8x32xf32>, vector<8x32xf32> -> vector<8x32xf32>
    %76 = arith.addf %54, %75 : vector<8x32xf32>
    %77 = vector.extract_strided_slice %6 {offsets = [0, 24], sizes = [8, 8], strides = [1, 1]} : vector<8x96xf32> to vector<8x8xf32>
    %cst_32 = arith.constant 0.353553385 : f32
    %78 = vector.broadcast %cst_32 : f32 to vector<8x8xf32>
    %79 = arith.mulf %77, %78 : vector<8x8xf32>
    %80 = vector.extract_strided_slice %6 {offsets = [0, 56], sizes = [8, 8], strides = [1, 1]} : vector<8x96xf32> to vector<8x8xf32>
    %81 = vector.extract_strided_slice %6 {offsets = [0, 88], sizes = [8, 8], strides = [1, 1]} : vector<8x96xf32> to vector<8x8xf32>
    %cst_33 = arith.constant dense<0.000000e+00> : vector<8x8xf32>
    %82 = tpu.matmul %79, %80, %cst_33 {dimension_numbers = #tpu.dot_dimension_numbers<[1], [1], [0], [0], [0, 0, 1, 0], [], []>} : vector<8x8xf32>, vector<8x8xf32>, vector<8x8xf32> -> vector<8x8xf32>
    %cst_34 = arith.constant 0xFF800000 : f32
    %83 = vector.broadcast %cst_34 : f32 to vector<8x8xf32>
    %84 = arith.select %9, %82, %83 : vector<8x8xi1>, vector<8x8xf32>
    %cst_35 = arith.constant dense<0xFF800000> : vector<8xf32>
    %85 = vector.multi_reduction <maximumf>, %84, %cst_35 [1] : vector<8x8xf32> to vector<8xf32>
    %86 = vector.shape_cast %85 : vector<8xf32> to vector<8x1xf32>
    %87 = vector.broadcast %86 : vector<8x1xf32> to vector<8x8xf32>
    %88 = arith.subf %84, %87 : vector<8x8xf32>
    %89 = math.exp %88 : vector<8x8xf32>
    %cst_36 = arith.constant dense<0.000000e+00> : vector<8xf32>
    %90 = vector.multi_reduction <add>, %89, %cst_36 [1] : vector<8x8xf32> to vector<8xf32>
    %91 = vector.shape_cast %90 : vector<8xf32> to vector<8x1xf32>
    %92 = tpu.reciprocal %91 : vector<8x1xf32> -> vector<8x1xf32>
    %93 = vector.broadcast %92 : vector<8x1xf32> to vector<8x8xf32>
    %94 = arith.mulf %89, %93 : vector<8x8xf32>
    %cst_37 = arith.constant dense<0.000000e+00> : vector<8x8xf32>
    %95 = tpu.matmul %94, %81, %cst_37 {dimension_numbers = #tpu.dot_dimension_numbers<[1], [0], [0], [1], [0, 0, 1, 1], [], []>} : vector<8x8xf32>, vector<8x8xf32>, vector<8x8xf32> -> vector<8x8xf32>
    %c24 = arith.constant 24 : index
    %c0_38 = arith.constant 0 : index
    %96 = vector.load %arg4[%c24, %c0_38] : memref<32x32xf32, #tpu.memory_space<vmem>>, vector<8x32xf32>
    %cst_39 = arith.constant dense<0.000000e+00> : vector<8x32xf32>
    %97 = tpu.matmul %95, %96, %cst_39 {dimension_numbers = #tpu.dot_dimension_numbers<[1], [0], [0], [1], [0, 0, 1, 1], [], []>} : vector<8x8xf32>, vector<8x32xf32>, vector<8x32xf32> -> vector<8x32xf32>
    %98 = arith.addf %76, %97 : vector<8x32xf32>
    %c0_40 = arith.constant 0 : index
    %c0_41 = arith.constant 0 : index
    %99 = vector.load %arg5[%c0_40, %c0_41] : memref<1x32xf32, #tpu.memory_space<vmem>>, vector<1x32xf32>
    %100 = vector.broadcast %99 : vector<1x32xf32> to vector<8x32xf32>
    %101 = arith.addf %98, %100 : vector<8x32xf32>
    %c0_42 = arith.constant 0 : index
    %c0_43 = arith.constant 0 : index
    %c0_44 = arith.constant 0 : index
    %102 = vector.load %arg6[%c0_42, %c0_43, %c0_44] : memref<1x8x32xf32, #tpu.memory_space<vmem>>, vector<1x8x32xf32>
    %103 = vector.shape_cast %102 : vector<1x8x32xf32> to vector<8x32xf32>
    %104 = vector.shape_cast %101 : vector<8x32xf32> to vector<1x8x32xf32>
    tpu.vector_store %arg6[%c0_42, %c0_43, %c0_44], %104 {strides = array<i32>} : memref<1x8x32xf32, #tpu.memory_space<vmem>>, vector<1x8x32xf32>,
    return
  }
  func.func @transform_0(%arg0: i32) -> (i32, i32, i32) {
    %c0_i32 = arith.constant 0 : i32
    %c0_i32_0 = arith.constant 0 : i32
    %c0_i32_1 = arith.constant 0 : i32
    return %arg0, %c0_i32, %c0_i32_0 : i32, i32, i32
  }
  func.func @transform_1(%arg0: i32) -> (i32, i32) {
    %c0_i32 = arith.constant 0 : i32
    %c0_i32_0 = arith.constant 0 : i32
    %c0_i32_1 = arith.constant 0 : i32
    return %c0_i32, %c0_i32_0 : i32, i32
  }
  func.func @transform_2(%arg0: i32) -> (i32, i32) {
    %c0_i32 = arith.constant 0 : i32
    %c0_i32_0 = arith.constant 0 : i32
    %c0_i32_1 = arith.constant 0 : i32
    return %c0_i32, %c0_i32_0 : i32, i32
  }
  func.func @transform_3(%arg0: i32) -> (i32, i32) {
    %c0_i32 = arith.constant 0 : i32
    %c0_i32_0 = arith.constant 0 : i32
    %c0_i32_1 = arith.constant 0 : i32
    return %c0_i32, %c0_i32_0 : i32, i32
  }
  func.func @transform_4(%arg0: i32) -> (i32, i32) {
    %c0_i32 = arith.constant 0 : i32
    %c0_i32_0 = arith.constant 0 : i32
    %c0_i32_1 = arith.constant 0 : i32
    return %c0_i32, %c0_i32_0 : i32, i32
  }
  func.func @transform_5(%arg0: i32) -> (i32, i32, i32) {
    %c0_i32 = arith.constant 0 : i32
    %c0_i32_0 = arith.constant 0 : i32
    %c0_i32_1 = arith.constant 0 : i32
    return %arg0, %c0_i32, %c0_i32_0 : i32, i32, i32
  }
}

</mosaic_0001>

<bundles_post_ra>
// kernel: tpu_custom_call.1
= control target key start
LH: loop header
LB: loop body
LE: loop exit
PB: predicated region body
PF: predicated region fallthrough
CT: control target
= control target key end

     0   :  { %10 = vsyncpa [#allocation3], 0  ;;  %s2222_s0 = inlined_call_operand.hbm [shape: f32[2,8,32], index: 0, kind: input, shape index: {}]   ;;  %s2223_s1 = inlined_call_operand.hbm [shape: f32[32,96], index: 1, kind: input, shape index: {}]   ;;  %s2224_s2 = inlined_call_operand.vmem [shape: f32[1,96], index: 2, kind: input, shape index: {}]   ;;  %s2225_s3 = inlined_call_operand.hbm [shape: f32[32,32], index: 3, kind: input, shape index: {}]   ;;  %s2226_s4 = inlined_call_operand.vmem [shape: f32[1,32], index: 4, kind: input, shape index: {}]   ;;  %s2227_s5 = inlined_call_operand.hbm [shape: f32[2,8,32], index: 5, kind: output, shape index: {}]  }
   0x1   :  { %12 = vsyncpa [#allocation3 + $0x1], 0 }
   0x2   :  { %13 = vsyncpa [#allocation6], 0 }
   0x3   :  { %14 = vsyncpa [#allocation4], 0 }
   0x4   :  { %16 = vsyncpa [#allocation4 + $0x1], 0  ;;  %s1884_s18 = smov 0   ;;  %s1886_s19 = smov 0  }
   0x5   :  { %s1888_s20 = smov 0   ;;  %s1890_s21 = smov 0  }
   0x6 LB: > { %s1905_s22 = sadd.s32 4294967295, %s1832_s21   ;;  %s1436_s23 = sadd.s32 4294967294, %s1832_s21   ;;  %s1832_s21 = sphi %s1890_s21, %s2247_s21   ;;  %s1828_s20 = sphi %s1888_s20, %s2246_s20   ;;  %s1824_s19 = sphi %s1886_s19, %s2245_s19   ;;  %s1820_s18 = sphi %s1884_s18, %s2244_s18  }
   0x7   : > { %p42_p0 = scmp.ne.s32.totalorder %s1824_s19, %s1820_s18  ;;  %p2228_p1 = scmp.eq.s32.totalorder %s1905_s22, 0 }
   0x8   : > { %p156_p3 = scmp.eq.s32.totalorder %s1436_s23, 1  ;;  %p1437_p5 = scmp.ge.s32.totalorder %s1832_s21, 1 }
   0x9   : > { %p1914_p4 = por %p2228_p1, %p42_p0  ;;  %p163_p7 = scmp.lt.s32.totalorder %s1832_s21, 3 }
   0xa   : > { %p1919_p6 = por %p156_p3, %p42_p0  ;;  %s1834_s27 = smov [#allocation5]  }
   0xb   : > { %s2231_s24 = scalar_select %p1914_p4, 1, 0 }
   0xc   : > { %s2232_s25 = scalar_select %p1919_p6, 1, 0 }
   0xd   : > { %p1924_p8 = pnand %p1437_p5, %p163_p7  ;;  %s175_s28 = sshll.u32 %s1834_s27, 4  ;;  %s1928_s28 = int_to_ptr.vmem [resolvable:$true] %s175_s28 }
   0xe   : > { %s1835_s30 = smov [#allocation7]   ;;  %s1676_s9 = scalar_lea.hbm %s2223_s1, 512 }
   0xf   : > { %p1589_p9 = pneg %p1924_p8  ;;  %s191_s6 = sshll.u32 %s1835_s30, 4  ;;  %s1939_s6 = int_to_ptr.vmem [resolvable:$true] %s191_s6 }
  0x10   : > { %p1677_p12 = scmp.ne.s32.totalorder %s2223_s1, %s1676_s9  ;;  %p1683_p5 = scmp.lt.u32.totalorder %s1676_s9, %s2223_s1 }
  0x11   : > { %p1935_p11 = pnand %p1589_p9, %p2228_p1 }
  0x13   : > { %p1678_p13 = pneg %p1935_p11 }
  0x15   : > { %p1679_p0 = pnand %p1678_p13, %p1677_p12 }
  0x17   : > { %p1680_p3 = pneg %p1679_p0 }
  0x19   : > { %p1685_p7 = pnand %p1683_p5, %p1680_p3 }
  0x1b   : > { %1688 = shalt.err (!%p1685_p7)
}
  0x1c   : > { %s1689_s14 = scalar_lea.vmem %s1928_s28, 512  ;;  %p1697_p2 = scmp.lt.s32.totalorder %s1928_s28, %s1928_s28 }
  0x1d   : > { %p1690_p9 = scmp.ne.s32.totalorder %s1928_s28, %s1689_s14  ;;  %p1698_p12 = scmp.lt.s32.totalorder %s1689_s14, %s1689_s14 }
  0x1f   : > { %p1692_p10 = pnand %p1690_p9, %p1678_p13  ;;  %p1699_p0 = por %p1698_p12, %p1697_p2 }
  0x21   : > { %p1693_p1 = pneg %p1692_p10 }
  0x23   : > { %p1700_p6 = pnand %p1699_p0, %p1693_p1 }
  0x25   : > { %1703 = shalt.err (!%p1700_p6)
}
  0x26   : > { %s1836_s15 = smov 128   ;;  %s1837_s16 = smov 8  }
  0x27   : > { %1592 = dma.hbm_to_vmem [thread:$0]  (!%p1935_p11), %s2223_s1, 512, %s1928_s28, [#allocation6], %s1836_s15, %s1836_s15, %s1837_s16  }
  0x28   : > { %s1704_s7 = scalar_lea.hbm %s2225_s3, 512 }
  0x29   : > { %p1705_p2 = scmp.ne.s32.totalorder %s2225_s3, %s1704_s7  ;;  %p1711_p10 = scmp.lt.u32.totalorder %s1704_s7, %s2225_s3 }
  0x2b   : > { %p1707_p1 = pnand %p1705_p2, %p1678_p13 }
  0x2d   : > { %p1708_p6 = pneg %p1707_p1 }
  0x2f   : > { %p1713_p3 = pnand %p1711_p10, %p1708_p6 }
  0x31   : > { %1716 = shalt.err (!%p1713_p3)
}
  0x32   : > { %s1717_s28 = scalar_lea.vmem %s1939_s6, 512  ;;  %p1725_p12 = scmp.lt.s32.totalorder %s1939_s6, %s1939_s6 }
  0x33   : > { %p1718_p5 = scmp.ne.s32.totalorder %s1939_s6, %s1717_s28  ;;  %p1726_p0 = scmp.lt.s32.totalorder %s1717_s28, %s1717_s28 }
  0x35   : > { %p1720_p7 = pnand %p1718_p5, %p1678_p13  ;;  %p1727_p2 = por %p1726_p0, %p1725_p12 }
  0x37   : > { %p1721_p9 = pneg %p1720_p7 }
  0x39   : > { %p1728_p1 = pnand %p1727_p2, %p1721_p9 }
  0x3b   : > { %1731 = shalt.err (!%p1728_p1)
}
  0x3c   : > { %1595 = dma.hbm_to_vmem [thread:$0]  (!%p1935_p11), %s2225_s3, 512, %s1939_s6, [#allocation6], %s1836_s15, %s1836_s15, %s1837_s16  }
  0x3d   : > { %s1994_s14 = sadd.s32 1, %s1832_s21   ;;  %s29_s29 = sadd.s32 1, %s1828_s20 }
  0x3e   : > { %s26_s17 = ssub.s32 %s1832_s21, %s1994_s14  ;;  %p36_p13 = scmp.ne.s32.totalorder %s1828_s20, %s1824_s19 }
  0x3f   : > { %p27_p6 = scmp.eq.s32.totalorder %s26_s17, 0  ;;  %p37_p10 = scmp.eq.s32.totalorder %s1832_s21, 0 }
  0x40   : > { %p2235_p3 = scmp.eq.s32.totalorder %s1905_s22, 1  ;;  %p1606_p7 = scmp.lt.s32.totalorder %s1832_s21, 2 }
  0x41   : > { %s2010_s27 = scalar_select %p27_p6, %s1828_s20, %s29_s29  }
  0x42   : > { %p2004_p5 = por %p2235_p3, %p36_p13  ;;  %p38_p9 = por %p37_p10, %p36_p13 }
  0x43   : > { %s208_s30 = sand.u32 1, %s1828_s20   ;;  %s1442_s6 = sshll.u32 %s1832_s21, 7 }
  0x44   : > { %s2236_s23 = scalar_select %p2004_p5, 1, 0 }
  0x45   : > { %s1441_s7 = sshll.u32 %s208_s30, 3  ;;  %s2017_s8 = scalar_lea.hbm %s2222_s0, %s1442_s6 }
  0x46   : > { %s212_s9 = scalar_lea.vmem [#allocation2], %s1441_s7  ;;  %p2021_p11 = pnand %p1606_p7, %p38_p9 }
  0x47   : > { %s219_s10 = sshll.u32 %s212_s9, 4  ;;  %s209_s28 = scalar_lea.sflag [#allocation3], %s208_s30  ;;  %s2019_s10 = int_to_ptr.vmem [resolvable:$true] %s219_s10 }
  0x48   : > { %s1732_s12 = scalar_lea.hbm %s2017_s8, 128  ;;  %p1734_p0 = pneg %p2021_p11 }
  0x49   : > { %p1733_p12 = scmp.ne.s32.totalorder %s2017_s8, %s1732_s12  ;;  %s1737_s17 = scalar_lea.hbm %s2222_s0, 256 }
  0x4a   : > { %p1738_p13 = scmp.lt.u32.totalorder %s2017_s8, %s2222_s0  ;;  %p1739_p6 = scmp.lt.u32.totalorder %s1737_s17, %s1732_s12 }
  0x4b   : > { %p1735_p2 = pnand %p1734_p0, %p1733_p12  ;;  %p1741_p3 = scmp.lt.u32.totalorder %s1732_s12, %s2017_s8 }
  0x4c   : > { %p1740_p10 = por %p1739_p6, %p1738_p13 }
  0x4d   : > { %p1736_p1 = pneg %p1735_p2 }
  0x4e   : > { %p1742_p7 = por %p1741_p3, %p1740_p10 }
  0x50   : > { %p1743_p9 = pnand %p1742_p7, %p1736_p1 }
  0x52   : > { %1746 = shalt.err (!%p1743_p9)
}
  0x53   : > { %s1747_s30 = scalar_lea.vmem %s2019_s10, 128  ;;  %s1838_s15 = smov [#allocation2]  }
  0x54   : > { %p1748_p12 = scmp.ne.s32.totalorder %s2019_s10, %s1747_s30  ;;  %s1752_s16 = sshll.u32 %s1838_s15, 4  ;;  %s1753_s16 = int_to_ptr.vmem [resolvable:$false] %s1752_s16 }
  0x55   : > { %s1754_s9 = scalar_lea.vmem %s1753_s16, 256  ;;  %p1755_p4 = scmp.lt.s32.totalorder %s2019_s10, %s1753_s16 }
  0x56   : > { %p1750_p2 = pnand %p1748_p12, %p1734_p0  ;;  %p1756_p13 = scmp.lt.s32.totalorder %s1754_s9, %s1747_s30 }
  0x58   : > { %p1751_p5 = pneg %p1750_p2  ;;  %p1757_p6 = por %p1756_p13, %p1755_p4 }
  0x5a   : > { %p1758_p10 = pnand %p1757_p6, %p1751_p5 }
  0x5c   : > { %1761 = shalt.err (!%p1758_p10)
}
  0x5d   : > { %1599 = dma.hbm_to_vmem [thread:$0]  (!%p2021_p11), %s2017_s8, 128, %s2019_s10, %s209_s28  }
  0x5e   : > { %228 = sbr.rel (%p1924_p8) target bundleno = 2694 (0xa86), region = 40  ;;  %s2053_s12 = sand.u32 (!%p1924_p8), 1, %s1824_s19  }
  0x5f   : > { %s1444_s13 = sshll.u32 (!%p1924_p8), %s2053_s12, 3  ;;  %s231_s29 = scalar_lea.sflag (!%p1924_p8), [#allocation3], %s2053_s12 }
  0x60   : > { %s234_s17 = scalar_lea.vmem (!%p1924_p8), [#allocation2], %s1444_s13  ;;  %p2238_p4 = scmp.ne.s32.totalorder (!%p1924_p8), %s2231_s24, 0 }
  0x65   : > { %1807 = dma.done.wait (%p2238_p4), %s231_s29, 128  }
  0x66   : > { %1809 = vsyncadd (%p2238_p4), %s231_s29, 4294967168  ;;  %p2239_p5 = scmp.eq.s32.totalorder %s1905_s22, 0 }
  0x68   : > { %1811 = dma.done.wait (%p2239_p5), [#allocation6], 1024   ;;  %p2240_p8 = pmov %p2239_p5 }
  0x69   : > { %v1839_v0 = vmov 0.0|0.0   ;;  %vm1840_vm0 = vmmov 0   ;;  %v1841_v1 = vmov 0.0   ;;  %v270_v2 = vld [vmem:[#allocation5] sm:$0xff]  ;;  %v271_v3 = vld [vmem:[#allocation5 + $0x8] sm:$0xff]  ;;  %v272_v4 = vld [vmem:[#allocation5 + $0x10] sm:$0xff]  ;;  %v355_v17 = vlaneseq }
  0x6a   : > { %1813 = vsyncadd (%p2240_p8), [#allocation6], 4294966272  ;;  %1571 = vmatprep.subr.bf16.mxu0 %v1839_v0  ;;  %1508 = vmatprep.mubr.msk.f32.mxu0 %vm1840_vm0, %v1841_v1  ;;  %v1572_v5 = vpack.c.bf16 %v271_v3, %v270_v2  ;;  %v273_v6 = vld [vmem:[#allocation5 + $0x18] sm:$0xff]  ;;  %vm281_vm1 = vcmask 261120   ;;  %v1448_v9 = vld [vmem:[%s2224_s2] ss:$0 sm:$0xff] }
  0x6b   : > { %1511 = vmatprep.subr.mxu1 %v1841_v1  ;;  %1513 = vmatprep.mubr.msk.f32.mxu1 %vm1840_vm0, %v1841_v1  ;;  %v1575_v7 = vpack.c.bf16 %v273_v6, %v272_v4  ;;  %v269_v8 = vld [vmem:[%s234_s17] sm:$0xff]  ;;  %s1842_s8 = smov 96   ;;  %s1843_s10 = smov 120   ;;  %vm364_vm2 = vcmask 64512   ;;  %v2098_v18 = vshrl.u32 %v355_v17, 7  ;;  %v2100_v19 = vand.u32 127, %v355_v17 }
  0x6c   : > { %1573 = vmatpush3.bf16.msra.mxu0 %v1572_v5  ;;  %s1844_s11 = smov 88   ;;  %s1845_s28 = smov 56   ;;  %v695_v38 = vld [vmem:[#allocation7 + $0x8] sm:$0xff]  ;;  %v528_v47 = vld [vmem:[#allocation7] sm:$0xff] }
  0x6d   : > { %1574 = vmatprep.subr.bf16.mxu0 %v1839_v0  ;;  %vm359_vm3 = vcmp.ge.s32.totalorder %v2098_v18, %v2100_v19  ;;  %s1846_s7 = smov 64   ;;  %s1847_s6 = smov 80   ;;  %v1249_v18 = vld [vmem:[#allocation7 + $0x18] sm:$0xff] }
  0x6e   : > { %s1848_s30 = smov 112   ;;  %s1849_s15 = smov 72  }
  0x6f   : > { %s1850_s16 = smov 104   ;;  %s1851_s9 = smov 48  }
  0x70   : > { %1576 = vmatpush3.bf16.msra.mxu0 %v1575_v7  ;;  %s1852_s29 = smov 40   ;;  %s1468_s26 = sshll.u32 %s1905_s22, 7 }
  0x71   : > { %1521 = vmatprep.subr.mxu0 %v1841_v1  ;;  %p2241_p0 = scmp.ne.s32.totalorder %s2236_s23, 0 }
  0x73   : > { %1509 = vmatmul.mubr.msk.f32.vlgmr.msra.gmra.mrb[0].mxu0 %vm281_vm1, %v269_v8 }
  0x74   : > { %1523 = vmatprep.mubr.msk.f32.mxu0 %vm1840_vm0, %v1841_v1 }
 0x146   : > { %v351_v10 = vpop.f32.mrb[0].mxu0 }
 0x147   : > { %v2079_v11 = vadd.f32 %v1448_v9, %v351_v10  ;;  %v1510_v12 = vpop.f32.mrb[1].mxu0 }
 0x148   : > { %v1008_v12 = vld [vmem:[#allocation7 + $0x10] sm:$0xff] }
 0x149   : > { %362 = vrot.lane.b32.xlu0 %v2079_v11, %s1842_s8  ;;  %v2083_v13 = vmul.f32 0.35355338, %v2079_v11  ;;  %s268_s8 = scalar_lea.vmem [#allocation8], %s1444_s13  ;;  %s1853_s13 = smov [#allocation8]  }
 0x14b   : > { %529 = vrot.lane.b32.xlu1 %v2083_v13, %s1843_s10  ;;  %s1347_s10 = sshll.u32 %s268_s8, 4  ;;  %s2179_s10 = int_to_ptr.vmem [resolvable:$true] %s1347_s10 }
 0x14c   : > { %s1762_s22 = scalar_lea.vmem %s2179_s10, 128 }
 0x14d   : > { %531 = vrot.lane.b32.xlu0 %v2079_v11, %s1844_s11  ;;  %p1763_p11 = scmp.ne.s32.totalorder %s2179_s10, %s1762_s22 }
 0x14f   : > { %p1764_p1 = pnand %p1763_p11, %p2241_p0 }
 0x151   : > { %p1765_p3 = pneg %p1764_p1 }
 0x1bb   : > { %v363_v14 = vpop.permute.xlu0 %362 }
 0x1bc   : > { %1512 = vmatpush3.xpose.msk.msra.mxu1 %vm364_vm2, %v363_v14 }
 0x1bd   : > { %1516 = vmatprep.subr.mxu1 %v1841_v1  ;;  %v530_v16 = vpop.permute.xlu1 %529 }
 0x1bf   : > { %v532_v15 = vpop.permute.xlu0 %531  ;;  %1514 = vmatmul.mubr.msk.f32.vlgmr.msra.gmra.mrb[0].mxu1 %vm364_vm2, %v2083_v13 }
 0x1c0   : > { %1522 = vmatpush3.xpose.msk.msra.mxu0 %vm364_vm2, %v532_v15  ;;  %1518 = vmatprep.mubr.msk.f32.mxu1 %vm1840_vm0, %v1841_v1 }
 0x1c1   : > { %1531 = vmatprep.subr.mxu0 %v1841_v1 }
 0x1c3   : > { %1524 = vmatmul.mubr.msk.f32.vlgmr.msra.gmra.mrb[2].mxu0 %vm364_vm2, %v530_v16 }
 0x1c4   : > { %1533 = vmatprep.mubr.msk.f32.mxu0 %vm1840_vm0, %v1841_v1  ;;  %1532 = vmatpush3.msra.mxu0 %v695_v38 }
 0x1c5   : > { %1541 = vmatprep.subr.mxu0 %v1841_v1 }
 0x292   : > { %v436_v20 = vpop.f32.mrb[0].mxu1 }
 0x293   : > { %v440_v21 = vsel %vm359_vm3, %v436_v20, -inf  ;;  %v1515_v22 = vpop.f32.mrb[1].mxu1 }
 0x294   : > { %v441_v23 = vsel %vm364_vm2, %v440_v21, -inf }
 0x295   : > { %442 = vmax.xlane.f32.xlu1 %v441_v23 }
 0x296   : > { %v603_v24 = vpop.f32.mrb[2].mxu0 }
 0x297   : > { %v607_v25 = vsel %vm359_vm3, %v603_v24, -inf  ;;  %v1525_v26 = vpop.f32.mrb[3].mxu0 }
 0x298   : > { %v608_v27 = vsel %vm364_vm2, %v607_v25, -inf }
 0x299   : > { %609 = vmax.xlane.f32.xlu0 %v608_v27 }
 0x322   : > { %v443_v28 = vpop.xlane.xlu1 %442 }
 0x323   : > { %v444_v29 = vsub.f32 %v440_v21, %v443_v28 }
 0x325   : > { %v445_v30 = vmul.f32 1.442695, %v444_v29 }
 0x326   : > { %v610_v31 = vpop.xlane.xlu0 %609 }
 0x327   : > { %1660 = vpow2.f32 %v445_v30  ;;  %v611_v32 = vsub.f32 %v607_v25, %v610_v31 }
 0x329   : > { %v612_v33 = vmul.f32 1.442695, %v611_v32 }
 0x32b   : > { %1662 = vpow2.f32 %v612_v33  ;;  %v1466_v33 = vld [vmem:[%s2226_s4] ss:$0 sm:$0xff] }
 0x331   : > { %v1661_v34 = vpop.eup %1660 }
 0x332   : > { %v447_v35 = vsel %vm364_vm2, %v1661_v34, 0.0 }
 0x333   : > { %448 = vadd.xlane.f32.xlu0 %v447_v35 }
 0x335   : > { %v1663_v36 = vpop.eup %1662 }
 0x336   : > { %v614_v37 = vsel %vm364_vm2, %v1663_v36, 0.0 }
 0x337   : > { %615 = vadd.xlane.f32.xlu1 %v614_v37 }
 0x348   : > { %619 = vrot.lane.b32.xlu1 %v2079_v11, %s1845_s28 }
 0x349   : > { %452 = vrot.lane.b32.xlu0 %v2079_v11, %s1846_s7  ;;  %s2177_s7 = scalar_lea.hbm %s2227_s5, %s1468_s26 }
 0x34c   : > { %844 = vrot.lane.b32.xlu1 %v2079_v11, %s1847_s6  ;;  %s1334_s6 = scalar_lea.sflag [#allocation4], %s2053_s12 }
 0x34d   : > { %842 = vrot.lane.b32.xlu0 %v2083_v13, %s1848_s30  ;;  %s1766_s30 = sshll.u32 %s1853_s13, 4  ;;  %s1767_s30 = int_to_ptr.vmem [resolvable:$false] %s1766_s30 }
 0x34e   : > { %p1769_p7 = scmp.lt.s32.totalorder %s2179_s10, %s1767_s30 }
 0x3c0   : > { %v449_v39 = vpop.xlane.xlu0 %448 }
 0x3c1   : > { %1664 = vrcp.f32 %v449_v39 }
 0x3c4   : > { %v616_v40 = vpop.xlane.xlu1 %615  ;;  %v453_v41 = vpop.permute.xlu0 %452 }
 0x3c5   : > { %1666 = vrcp.f32 %v616_v40  ;;  %1517 = vmatpush3.msra.mxu1 %v453_v41 }
 0x3c6   : > { %1526 = vmatprep.subr.mxu1 %v1841_v1 }
 0x3c8   : > { %v620_v44 = vpop.permute.xlu1 %619  ;;  %v843_v53 = vpop.permute.xlu0 %842 }
 0x3cb   : > { %v1665_v42 = vpop.eup %1664 }
 0x3cc   : > { %v451_v43 = vmul.f32 %v1665_v42, %v1661_v34  ;;  %v845_v51 = vpop.permute.xlu1 %844 }
 0x3ce   : > { %1519 = vmatmul.mubr.msk.f32.vlgmr.msra.gmra.mrb[2].mxu1 %vm364_vm2, %v451_v43 }
 0x3cf   : > { %v1667_v45 = vpop.eup %1666  ;;  %1527 = vmatpush3.msra.mxu1 %v620_v44  ;;  %1528 = vmatprep.mubr.msk.f32.mxu1 %vm1840_vm0, %v1841_v1 }
 0x3d0   : > { %v618_v46 = vmul.f32 %v1667_v45, %v1663_v36  ;;  %1536 = vmatprep.subr.mxu1 %v1841_v1 }
 0x3d2   : > { %1529 = vmatmul.mubr.msk.f32.vlgmr.msra.gmra.mrb[4].mxu1 %vm364_vm2, %v618_v46 }
 0x3d3   : > { %1538 = vmatprep.mubr.msk.f32.mxu1 %vm1840_vm0, %v1841_v1  ;;  %1537 = vmatpush3.msra.mxu1 %v528_v47 }
 0x3d4   : > { %1546 = vmatprep.subr.mxu1 %v1841_v1 }
 0x4a1   : > { %v524_v48 = vpop.f32.mrb[2].mxu1 }
 0x4a2   : > { %v1520_v49 = vpop.f32.mrb[3].mxu1  ;;  %1539 = vmatmul.mubr.msk.f32.vlgmr.msra.gmra.mrb[6].mxu1 %vm364_vm2, %v524_v48 }
 0x4a3   : > { %1548 = vmatprep.mubr.msk.f32.mxu1 %vm1840_vm0, %v1841_v1 }
 0x4a5   : > { %v691_v50 = vpop.f32.mrb[4].mxu1 }
 0x4a6   : > { %v1530_v52 = vpop.f32.mrb[5].mxu1  ;;  %1534 = vmatmul.mubr.msk.f32.vlgmr.msra.gmra.mrb[4].mxu0 %vm364_vm2, %v691_v50 }
 0x4a7   : > { %1542 = vmatpush3.xpose.msk.msra.mxu0 %vm364_vm2, %v845_v51  ;;  %1543 = vmatprep.mubr.msk.f32.mxu0 %vm1840_vm0, %v1841_v1 }
 0x4a8   : > { %1551 = vmatprep.subr.mxu0 %v1841_v1 }
 0x4aa   : > { %1544 = vmatmul.mubr.msk.f32.vlgmr.msra.gmra.mrb[6].mxu0 %vm364_vm2, %v843_v53 }
 0x4ab   : > { %1553 = vmatprep.mubr.msk.f32.mxu0 %vm1840_vm0, %v1841_v1  ;;  %1552 = vmatpush3.msra.mxu0 %v1008_v12 }
 0x4ac   : > { %1561 = vmatprep.subr.mxu0 %v1841_v1 }
 0x575   : > { %v838_v54 = vpop.f32.mrb[6].mxu1 }
 0x576   : > { %v1540_v55 = vpop.f32.mrb[7].mxu1 }
 0x579   : > { %v765_v56 = vpop.f32.mrb[4].mxu0 }
 0x57a   : > { %v839_v57 = vadd.f32 %v838_v54, %v765_v56  ;;  %v1535_v58 = vpop.f32.mrb[5].mxu0 }
 0x57d   : > { %v916_v59 = vpop.f32.mrb[6].mxu0 }
 0x57e   : > { %v920_v60 = vsel %vm359_vm3, %v916_v59, -inf  ;;  %v1545_v61 = vpop.f32.mrb[7].mxu0 }
 0x57f   : > { %v921_v62 = vsel %vm364_vm2, %v920_v60, -inf }
 0x580   : > { %922 = vmax.xlane.f32.xlu1 %v921_v62 }
 0x591   : > { %1085 = vrot.lane.b32.xlu1 %v2079_v11, %s1849_s15  ;;  %s1768_s15 = scalar_lea.vmem %s1767_s30, 256 }
 0x592   : > { %p1770_p9 = scmp.lt.s32.totalorder %s1768_s15, %s1762_s22 }
 0x594   : > { %p1771_p12 = por %p1770_p9, %p1769_p7 }
 0x595   : > { %1083 = vrot.lane.b32.xlu1 %v2083_v13, %s1850_s16 }
 0x596   : > { %p1772_p2 = pnand %p1771_p12, %p1765_p3 }
 0x60d   : > { %v923_v63 = vpop.xlane.xlu1 %922 }
 0x60e   : > { %v924_v0 = vsub.f32 %v920_v60, %v923_v63 }
 0x610   : > { %v925_v2 = vmul.f32 1.442695, %v924_v0 }
 0x611   : > { %v1086_v8 = vpop.permute.xlu1 %1085 }
 0x612   : > { %1668 = vpow2.f32 %v925_v2 }
 0x615   : > { %v1084_v10 = vpop.permute.xlu1 %1083 }
 0x61c   : > { %v1669_v3 = vpop.eup %1668 }
 0x61d   : > { %v927_v4 = vsel %vm364_vm2, %v1669_v3, 0.0 }
 0x61e   : > { %928 = vadd.xlane.f32.xlu0 %v927_v4 }
 0x634   : > { %932 = vrot.lane.b32.xlu0 %v2079_v11, %s1851_s9 }
 0x6ab   : > { %v929_v5 = vpop.xlane.xlu0 %928 }
 0x6ac   : > { %1670 = vrcp.f32 %v929_v5 }
 0x6af   : > { %v933_v6 = vpop.permute.xlu0 %932 }
 0x6b0   : > { %1547 = vmatpush3.msra.mxu1 %v933_v6 }
 0x6b1   : > { %1556 = vmatprep.subr.mxu1 %v1841_v1 }
 0x6b6   : > { %v1671_v7 = vpop.eup %1670 }
 0x6b7   : > { %v931_v9 = vmul.f32 %v1671_v7, %v1669_v3 }
 0x6b9   : > { %1549 = vmatmul.mubr.msk.f32.vlgmr.msra.gmra.mrb[8].mxu1 %vm364_vm2, %v931_v9 }
 0x6ba   : > { %1557 = vmatpush3.xpose.msk.msra.mxu1 %vm364_vm2, %v1086_v8  ;;  %1558 = vmatprep.mubr.msk.f32.mxu1 %vm1840_vm0, %v1841_v1 }
 0x6bb   : > { %1566 = vmatprep.subr.mxu1 %v1841_v1 }
 0x6bd   : > { %1559 = vmatmul.mubr.msk.f32.vlgmr.msra.gmra.mrb[10].mxu1 %vm364_vm2, %v1084_v10 }
 0x6be   : > { %1568 = vmatprep.mubr.msk.f32.mxu1 %vm1840_vm0, %v1841_v1  ;;  %1567 = vmatpush3.msra.mxu1 %v1249_v18 }
 0x78c   : > { %v1004_v13 = vpop.f32.mrb[8].mxu1 }
 0x78d   : > { %v1550_v14 = vpop.f32.mrb[9].mxu1  ;;  %1554 = vmatmul.mubr.msk.f32.vlgmr.msra.gmra.mrb[8].mxu0 %vm364_vm2, %v1004_v13 }
 0x78e   : > { %1563 = vmatprep.mubr.msk.f32.mxu0 %vm1840_vm0, %v1841_v1 }
 0x790   : > { %v1157_v15 = vpop.f32.mrb[10].mxu1 }
 0x791   : > { %v1161_v16 = vsel %vm359_vm3, %v1157_v15, -inf  ;;  %v1560_v17 = vpop.f32.mrb[11].mxu1 }
 0x792   : > { %v1162_v20 = vsel %vm364_vm2, %v1161_v16, -inf }
 0x793   : > { %1163 = vmax.xlane.f32.xlu0 %v1162_v20 }
 0x7a9   : > { %1173 = vrot.lane.b32.xlu0 %v2079_v11, %s1852_s29 }
 0x820   : > { %v1164_v21 = vpop.xlane.xlu0 %1163 }
 0x821   : > { %v1165_v22 = vsub.f32 %v1161_v16, %v1164_v21 }
 0x823   : > { %v1166_v23 = vmul.f32 1.442695, %v1165_v22 }
 0x824   : > { %v1174_v24 = vpop.permute.xlu0 %1173 }
 0x825   : > { %1672 = vpow2.f32 %v1166_v23  ;;  %1562 = vmatpush3.msra.mxu0 %v1174_v24 }
 0x82f   : > { %v1673_v25 = vpop.eup %1672 }
 0x830   : > { %v1168_v1 = vsel %vm364_vm2, %v1673_v25, 0.0 }
 0x831   : > { %1169 = vadd.xlane.f32.xlu1 %v1168_v1 }
 0x860   : > { %v1078_v19 = vpop.f32.mrb[8].mxu0 }
 0x861   : > { %v1082_v26 = vadd.f32 %v1078_v19, %v839_v57  ;;  %v1555_v27 = vpop.f32.mrb[9].mxu0 }
 0x8be   : > { %v1170_v28 = vpop.xlane.xlu1 %1169 }
 0x8bf   : > { %1674 = vrcp.f32 %v1170_v28 }
 0x8c9   : > { %v1675_v11 = vpop.eup %1674 }
 0x8ca   : > { %v1172_v29 = vmul.f32 %v1675_v11, %v1673_v25 }
 0x8cc   : > { %1564 = vmatmul.mubr.msk.f32.vlgmr.msra.gmra.mrb[10].mxu0 %vm364_vm2, %v1172_v29 }
 0x99f   : > { %v1245_v30 = vpop.f32.mrb[10].mxu0 }
 0x9a0   : > { %v1565_v31 = vpop.f32.mrb[11].mxu0  ;;  %1569 = vmatmul.mubr.msk.f32.vlgmr.msra.gmra.mrb[12].mxu1 %vm364_vm2, %v1245_v30 }
 0xa73   : > { %v1319_v32 = vpop.f32.mrb[12].mxu1 }
 0xa74   : > { %v1323_v34 = vadd.f32 %v1319_v32, %v1082_v26  ;;  %v1570_v35 = vpop.f32.mrb[13].mxu1 }
 0xa76   : > { %v1331_v36 = vadd.f32 %v1466_v33, %v1323_v34 }
 0xa78   : > { %1332 = vst.msk [vmem:[%s268_s8] sm:$0xff] %vm281_vm1, %v1331_v36 }
 0xa79   : > { %1775 = shalt.err (!%p1772_p2)
}
 0xa7a   : > { %s1776_s12 = scalar_lea.hbm %s2177_s7, 128  ;;  %s1780_s29 = scalar_lea.hbm %s2227_s5, 256 }
 0xa7b   : > { %p1777_p13 = scmp.ne.s32.totalorder %s2177_s7, %s1776_s12  ;;  %p1781_p4 = scmp.lt.u32.totalorder %s2177_s7, %s2227_s5 }
 0xa7c   : > { %p1782_p5 = scmp.lt.u32.totalorder %s1780_s29, %s1776_s12  ;;  %p1784_p11 = scmp.lt.u32.totalorder %s1776_s12, %s2177_s7 }
 0xa7d   : > { %p1778_p6 = pnand %p1777_p13, %p2241_p0 }
 0xa7e   : > { %p1783_p8 = por %p1782_p5, %p1781_p4 }
 0xa7f   : > { %p1779_p10 = pneg %p1778_p6 }
 0xa80   : > { %p1785_p1 = por %p1784_p11, %p1783_p8 }
 0xa82   : > { %p1786_p3 = pnand %p1785_p1, %p1779_p10 }
 0xa84   : > { %1789 = shalt.err (!%p1786_p3)
}
 0xa85   : > { %1587 = dma.vmem_to_hbm [thread:$0]  (%p2241_p0), %s2179_s10, 128, %s2177_s7, %s1334_s6  }
 0xa86 PF: > { %s1359_s26 = sand.u32 1, %s1820_s18   ;;  %p2242_p7 = scmp.ne.s32.totalorder %s2232_s25, 0 }
 0xa87   : > { %p2243_p9 = scmp.ge.s32.totalorder %s1832_s21, 2  ;;  %s1360_s8 = scalar_lea.sflag [#allocation4], %s1359_s26 }
 0xa89   : > { %p1601_p12 = pnand %p2243_p9, %p2242_p7 }
 0xa8b   : > { %1815 = dma.done.wait (!%p1601_p12), %s1360_s8, 128  }
 0xa8c   : > { %1817 = vsyncadd (!%p1601_p12), %s1360_s8, 4294967168  ;;  %p19_p2 = scmp.ge.s32.totalorder %s1994_s14, 4   ;;  %s2244_s18 = smov %s1824_s19 }
 0xa8d   : > { %s2245_s19 = smov %s1828_s20  ;;  %s2246_s20 = smov %s2010_s27 }
 0xa8e   : > { %s2247_s21 = smov %s1994_s14  ;;  %21 = sbr.rel (!%p19_p2) target bundleno = 6 (0x6), region = 93 }
 0xa95   :  { %1365 = vsyncpa [#allocation3], 1 }
 0xa96   :  { %1367 = vsyncpa [#allocation3 + $0x1], 1 }
 0xa97   :  { %1368 = vsyncpa [#allocation6], 1 }
 0xa98   :  { %1369 = vsyncpa [#allocation4], 1 }
 0xa99   :  { %1371 = vsyncpa [#allocation4 + $0x1], 1 }

</bundles_post_ra>
